<compile_context>
chip_gen: v7x
topology: tpu7x:2x2x1
jax: 0.10.0
libtpu: 0.0.40
codegen_flags: <defaults>
</compile_context>

<pallas_src>
import functools

import jax
import jax.numpy as jnp
from jax import lax
from jax.experimental import pallas as pl
from jax.experimental.pallas import tpu as pltpu


def _round_up(x, m):
    return ((x + m - 1) // m) * m


def _fft_mid_kernel(amp_ref, pha_ref, prm_ref, re_ref, im_ref):
    # amp_ref/pha_ref/re_ref/im_ref: (TR, TL) f32 tiles (rows = B*C, lanes = freq)
    # prm_ref: (TR, 4) packed per-row params [w_amp, b_amp, w_pha, b_pha]
    amp = amp_ref[...]
    pha = pha_ref[...]
    prm = prm_ref[...]

    wa = prm[:, 0:1]
    ba = prm[:, 1:2]
    wp = prm[:, 2:3]
    bp = prm[:, 3:4]

    # depthwise 1x1 conv (groups == channels) == per-channel affine
    amp_fea = amp * wa + ba                          # (TR,1) broadcast along lanes
    pha_fea = pha * wp + bp

    # NOTE: the real part gets +1e-8 twice in the torch code:
    #   "amp*cos + 1e-8" then "complex(...) + 1e-8" (scalar adds to real only),
    # hence the folded 2e-8 below. Do NOT "fix" this.
    re_ref[...] = amp_fea * jnp.cos(pha_fea) + jnp.float32(2e-8)
    im_ref[...] = amp_fea * jnp.sin(pha_fea) + jnp.float32(1e-8)


def _choose_tiles(R, L):
    """Row tile (multiple of 8) and lane tile (multiple of 128), plus padded dims."""
    r8 = _round_up(R, 8)
    TR = min(r8, 64)
    R_pad = _round_up(r8, TR)

    l128 = _round_up(L, 128)
    TL = min(l128, 2048)
    L_pad = _round_up(l128, TL)
    return TR, TL, R_pad, L_pad


@functools.partial(jax.jit, static_argnums=())
def fft_forward_pallas(x, w_amp, b_amp, w_pha, b_pha):
    """x: (B, C, H, W) float32.
    w_amp/b_amp/w_pha/b_pha: (C,) depthwise-1x1 conv weights/biases.
    Returns (B, C, H, W) float32 matching FFT.forward."""
    B, C, H, W = x.shape
    Wf = W // 2 + 1
    L = H * Wf
    R = B * C

    TR, TL, R_pad, L_pad = _choose_tiles(R, L)

    # TODO(synk): rfft2/irfft2 have no Pallas TPU equivalent; they remain XLA ops.
    fre = jnp.fft.rfft2(x, axes=(-2, -1), norm="backward")       # (B,C,H,Wf) c64
    # complex -> real boundary (Pallas refs can't hold complex dtypes)
    amp = jnp.abs(fre).reshape(R, L)        # contiguous reshape: no data movement
    pha = jnp.angle(fre).reshape(R, L)

    # Pad rows to a multiple of TR and lanes to a multiple of TL so every
    # kernel store is a full, unmasked lane-dense vst.
    amp_p = jnp.pad(amp, ((0, R_pad - R), (0, L_pad - L)))
    pha_p = jnp.pad(pha, ((0, R_pad - R), (0, L_pad - L)))

    # Pack the 4 per-channel params into one (R_pad, 4) array (one DMA/step).
    prm = jnp.stack([w_amp, b_amp, w_pha, b_pha], axis=-1).astype(jnp.float32)  # (C,4)
    prm = jnp.tile(prm, (B, 1))                                                 # (R,4)
    prm = jnp.pad(prm, ((0, R_pad - R), (0, 0)))                                # (R_pad,4)

    io_spec = pl.BlockSpec((TR, TL), lambda r, l: (r, l))
    prm_spec = pl.BlockSpec((TR, 4), lambda r, l: (r, 0))

    # Per-step live VMEM: 2 (double-buffer) x 4 big tiles x TR x TL x 4B (+ params).
    step_bytes = (4 * TR * TL + TR * 128) * 4
    vmem_limit = int(min(96 * 1024 * 1024, max(24 * 1024 * 1024, 3 * step_bytes)))

    re, im = pl.pallas_call(
        _fft_mid_kernel,
        out_shape=(jax.ShapeDtypeStruct((R_pad, L_pad), jnp.float32),
                   jax.ShapeDtypeStruct((R_pad, L_pad), jnp.float32)),
        grid_spec=pltpu.PrefetchScalarGridSpec(
            num_scalar_prefetch=0,
            grid=(R_pad // TR, L_pad // TL),
            in_specs=[io_spec, io_spec, prm_spec],
            out_specs=(io_spec, io_spec),
        ),
        # amp/pha are dead after the kernel; alias them onto re/im to halve the
        # HBM footprint of the spectral intermediates.
        input_output_aliases={0: 0, 1: 1},
        compiler_params=pltpu.CompilerParams(
            dimension_semantics=("parallel", "parallel"),
            vmem_limit_bytes=vmem_limit),
    )(amp_p, pha_p, prm)

    re = re[:R, :L].reshape(B, C, H, Wf)
    im = im[:R, :L].reshape(B, C, H, Wf)

    z = lax.complex(re, im)
    out = jnp.abs(jnp.fft.irfft2(z, s=(H, W), axes=(-2, -1), norm="backward"))
    return out


def _reference(x, w_amp, b_amp, w_pha, b_pha):
    # Pure-JAX mirror of the PyTorch forward.
    B, C, H, W = x.shape
    fre = jnp.fft.rfft2(x, axes=(-2, -1), norm="backward")
    amp = jnp.abs(fre)
    pha = jnp.angle(fre)
    amp_fea = amp * w_amp[None, :, None, None] + b_amp[None, :, None, None]
    pha_fea = pha * w_pha[None, :, None, None] + b_pha[None, :, None, None]
    real = amp_fea * jnp.cos(pha_fea) + 1e-8
    imag = amp_fea * jnp.sin(pha_fea) + 1e-8
    out = lax.complex(real, imag) + 1e-8
    return jnp.abs(jnp.fft.irfft2(out, s=(H, W), axes=(-2, -1), norm="backward"))


if __name__ == "__main__":
    key = jax.random.PRNGKey(0)
    kx, kwa, kba, kwp, kbp = jax.random.split(key, 5)

    # Primary small test: (B, C, H, W) = (2, 4, 16, 16)
    B, C, H, W = 2, 4, 16, 16
    x = jax.random.normal(kx, (B, C, H, W), dtype=jnp.float32)
    # Deterministic synthetic params (match nn.Conv2d(C, C, 1, groups=C), squeezed).
    w_amp = jax.random.normal(kwa, (C,), dtype=jnp.float32) * 0.5
    b_amp = jax.random.normal(kba, (C,), dtype=jnp.float32) * 0.1
    w_pha = jax.random.normal(kwp, (C,), dtype=jnp.float32) * 0.5
    b_pha = jax.random.normal(kbp, (C,), dtype=jnp.float32) * 0.1

    out = fft_forward_pallas(x, w_amp, b_amp, w_pha, b_pha)
    out = jax.block_until_ready(out)
    ref = _reference(x, w_amp, b_amp, w_pha, b_pha)
    assert out.shape == (B, C, H, W)
    assert jnp.allclose(out, ref, atol=1e-4, rtol=1e-4), "mismatch vs reference"

    # Secondary check: odd sizes (C % 8 != 0, L % 128 != 0) exercise the
    # row/lane padding path.
    B2, C2, H2, W2 = 1, 3, 12, 10
    x2 = jax.random.normal(kx, (B2, C2, H2, W2), dtype=jnp.float32)
    wa2 = jax.random.normal(kwa, (C2,), dtype=jnp.float32) * 0.5
    ba2 = jax.random.normal(kba, (C2,), dtype=jnp.float32) * 0.1
    wp2 = jax.random.normal(kwp, (C2,), dtype=jnp.float32) * 0.5
    bp2 = jax.random.normal(kbp, (C2,), dtype=jnp.float32) * 0.1
    out2 = jax.block_until_ready(fft_forward_pallas(x2, wa2, ba2, wp2, bp2))
    ref2 = _reference(x2, wa2, ba2, wp2, bp2)
    assert jnp.allclose(out2, ref2, atol=1e-4, rtol=1e-4), "mismatch vs reference (odd shapes)"

    print("KERNEL_OK")
</pallas_src>

<mosaic_0001>
module attributes {stable_mosaic.version = 11 : i64} {
  func.func @_fft_mid_kernel(%arg0: i32, %arg1: i32, %arg2: memref<8x256xf32, #tpu.memory_space<vmem>>, %arg3: memref<8x256xf32, #tpu.memory_space<vmem>>, %arg4: memref<8x4xf32, #tpu.memory_space<vmem>>, %arg5: memref<8x256xf32, #tpu.memory_space<vmem>>, %arg6: memref<8x256xf32, #tpu.memory_space<vmem>>) attributes {dimension_semantics = [#tpu.dimension_semantics<parallel>, #tpu.dimension_semantics<parallel>], iteration_bounds = array<i64: 1, 1>, scalar_prefetch = 0 : i64, scratch_operands = 0 : i64, tpu.core_type = #tpu.core_type<tc>, window_params = [{transform_indices = @transform_0, window_bounds = array<i64: 8, 256>}, {transform_indices = @transform_1, window_bounds = array<i64: 8, 256>}, {transform_indices = @transform_2, window_bounds = array<i64: 8, 4>}, {transform_indices = @transform_3, window_bounds = array<i64: 8, 256>}, {transform_indices = @transform_4, window_bounds = array<i64: 8, 256>}]} {
    %c0 = arith.constant 0 : index
    %c0_0 = arith.constant 0 : index
    %0 = vector.load %arg2[%c0, %c0_0] : memref<8x256xf32, #tpu.memory_space<vmem>>, vector<8x256xf32>
    %c0_1 = arith.constant 0 : index
    %c0_2 = arith.constant 0 : index
    %1 = vector.load %arg3[%c0_1, %c0_2] : memref<8x256xf32, #tpu.memory_space<vmem>>, vector<8x256xf32>
    %c0_3 = arith.constant 0 : index
    %c0_4 = arith.constant 0 : index
    %2 = vector.load %arg4[%c0_3, %c0_4] : memref<8x4xf32, #tpu.memory_space<vmem>>, vector<8x4xf32>
    %3 = vector.extract_strided_slice %2 {offsets = [0, 0], sizes = [8, 1], strides = [1, 1]} : vector<8x4xf32> to vector<8x1xf32>
    %4 = vector.extract_strided_slice %2 {offsets = [0, 1], sizes = [8, 1], strides = [1, 1]} : vector<8x4xf32> to vector<8x1xf32>
    %5 = vector.extract_strided_slice %2 {offsets = [0, 2], sizes = [8, 1], strides = [1, 1]} : vector<8x4xf32> to vector<8x1xf32>
    %6 = vector.extract_strided_slice %2 {offsets = [0, 3], sizes = [8, 1], strides = [1, 1]} : vector<8x4xf32> to vector<8x1xf32>
    %7 = vector.broadcast %3 : vector<8x1xf32> to vector<8x256xf32>
    %8 = arith.mulf %0, %7 : vector<8x256xf32>
    %9 = vector.broadcast %4 : vector<8x1xf32> to vector<8x256xf32>
    %10 = arith.addf %8, %9 : vector<8x256xf32>
    %11 = vector.broadcast %5 : vector<8x1xf32> to vector<8x256xf32>
    %12 = arith.mulf %1, %11 : vector<8x256xf32>
    %13 = vector.broadcast %6 : vector<8x1xf32> to vector<8x256xf32>
    %14 = arith.addf %12, %13 : vector<8x256xf32>
    %15 = math.cos %14 : vector<8x256xf32>
    %16 = arith.mulf %10, %15 : vector<8x256xf32>
    %cst = arith.constant 2.000000e-08 : f32
    %17 = vector.broadcast %cst : f32 to vector<8x256xf32>
    %18 = arith.addf %16, %17 : vector<8x256xf32>
    %c0_5 = arith.constant 0 : index
    %c0_6 = arith.constant 0 : index
    %19 = vector.load %arg5[%c0_5, %c0_6] : memref<8x256xf32, #tpu.memory_space<vmem>>, vector<8x256xf32>
    tpu.vector_store %arg5[%c0_5, %c0_6], %18 {strides = array<i32>} : memref<8x256xf32, #tpu.memory_space<vmem>>, vector<8x256xf32>,
    %20 = math.sin %14 : vector<8x256xf32>
    %21 = arith.mulf %10, %20 : vector<8x256xf32>
    %cst_7 = arith.constant 9.99999993E-9 : f32
    %22 = vector.broadcast %cst_7 : f32 to vector<8x256xf32>
    %23 = arith.addf %21, %22 : vector<8x256xf32>
    %c0_8 = arith.constant 0 : index
    %c0_9 = arith.constant 0 : index
    %24 = vector.load %arg6[%c0_8, %c0_9] : memref<8x256xf32, #tpu.memory_space<vmem>>, vector<8x256xf32>
    tpu.vector_store %arg6[%c0_8, %c0_9], %23 {strides = array<i32>} : memref<8x256xf32, #tpu.memory_space<vmem>>, vector<8x256xf32>,
    return
  }
  func.func @transform_0(%arg0: i32, %arg1: i32) -> (i32, i32) {
    %c0_i32 = arith.constant 0 : i32
    return %arg0, %arg1 : i32, i32
  }
  func.func @transform_1(%arg0: i32, %arg1: i32) -> (i32, i32) {
    %c0_i32 = arith.constant 0 : i32
    return %arg0, %arg1 : i32, i32
  }
  func.func @transform_2(%arg0: i32, %arg1: i32) -> (i32, i32) {
    %c0_i32 = arith.constant 0 : i32
    %c0_i32_0 = arith.constant 0 : i32
    return %arg0, %c0_i32 : i32, i32
  }
  func.func @transform_3(%arg0: i32, %arg1: i32) -> (i32, i32) {
    %c0_i32 = arith.constant 0 : i32
    return %arg0, %arg1 : i32, i32
  }
  func.func @transform_4(%arg0: i32, %arg1: i32) -> (i32, i32) {
    %c0_i32 = arith.constant 0 : i32
    return %arg0, %arg1 : i32, i32
  }
}

</mosaic_0001>

<bundles_post_ra>
// kernel: fft_forward_pallas.1
= control target key start
LH: loop header
LB: loop body
LE: loop exit
PB: predicated region body
PF: predicated region fallthrough
CT: control target
= control target key end

     0   :  { %v526_v0 = vmov 2   ;;  %v527_v2 = vmov 0   ;;  %v528_v3 = vmov 3   ;;  %v529_v4 = vmov 1   ;;  %s650_s2 = inlined_call_operand.vmem [shape: f32[8,4], index: 2, kind: input, shape index: {}]   ;;  %s651_s1 = inlined_call_operand.vmem [shape: f32[8,256], index: 1, kind: input, shape index: {}, may-alias: {1,4}]   ;;  %s652_s0 = inlined_call_operand.vmem [shape: f32[8,256], index: 0, kind: input, shape index: {}, may-alias: {0,3}]   ;;  %s653_s3 = inlined_call_operand.vmem [shape: f32[8,256], index: 3, kind: output, shape index: {0}, may-alias: {0,3}]   ;;  %s654_s4 = inlined_call_operand.vmem [shape: f32[8,256], index: 4, kind: output, shape index: {1}, may-alias: {1,4}]  }
   0x1   :  { %514 = vset.pattern.permute.xlu0 %v526_v0  ;;  %v20_v1 = vld [vmem:[%s650_s2] sm:$0xff]  ;;  %516 = vset.pattern.permute.xlu1 %v527_v2  ;;  %v19_v7 = vld [vmem:[%s651_s1 + $0x8] sm:$0xff]  ;;  %v530_v33 = vmov 683565275   ;;  %v531_v37 = vmov 2475754826  }
   0x2   :  { %35 = vperm.xlu0 %514, %v20_v1   ;;  %23 = vperm.xlu1 %516, %v20_v1   ;;  %v18_v6 = vld [vmem:[%s651_s1] sm:$0xff]  ;;  %v532_v39 = vmov 2131351028   ;;  %v533_v41 = vmov 2102212464  }
   0x3   :  { %v534_v43 = vmov 920167782   ;;  %v535_v50 = vmov 1326507024  }
   0x6   :  { %515 = vset.pattern.permute.xlu0 %v528_v3  ;;  %517 = vset.pattern.permute.xlu1 %v529_v4 }
   0x7   :  { %41 = vperm.xlu0 %515, %v20_v1   ;;  %29 = vperm.xlu1 %517, %v20_v1  }
  0x81   :  { %v36_v5 = vpop.permute.xlu0 %35 }
  0x82   :  { %v38_v8 = vmul.f32 %v36_v5, %v18_v6  ;;  %v39_v9 = vmul.f32 %v36_v5, %v19_v7 }
  0x86   :  { %v42_v10 = vpop.permute.xlu0 %41 }
  0x87   :  { %v570_v11 = vadd.f32 %v42_v10, %v38_v8  ;;  %v572_v12 = vadd.f32 %v42_v10, %v39_v9 }
  0x89   :  { %v46_v13 = vand.u32 2147483647, %v570_v11  ;;  %v49_v14 = vand.u32 2139095040, %v570_v11  ;;  %v152_v15 = vand.u32 2139095040, %v572_v12  ;;  %v149_v18 = vand.u32 2147483647, %v572_v12 }
  0x8a   :  { %vm48_vm14 = vcmp.lt.s32.totalorder %v570_v11, 0 }
  0x8b   :  { %v50_v16 = vshrl.u32 %v49_v14, 23  ;;  %v53_v17 = vand.u32 8388607, %v46_v13  ;;  %v153_v19 = vshrl.u32 %v152_v15, 23  ;;  %v582_v24 = vand.u32 8388607, %v149_v18 }
  0x8c   :  { %vm47_vm15 = vcmp.le.f32.partialorder %v46_v13, 0.7853982 }
  0x8d   :  { %v480_v20 = vadd.s32 4294967169, %v50_v16  ;;  %v484_v21 = vadd.s32 4294967169, %v153_v19  ;;  %v54_v23 = vor.u32 8388608, %v53_v17  ;;  %v157_v31 = vor.u32 8388608, %v582_v24 }
  0x8f   :  { %v56_v22 = vadd.s32 1, %v480_v20  ;;  %v159_v25 = vadd.s32 1, %v484_v21  ;;  %v584_v30 = vshll.u32 %v54_v23, 8 }
  0x91   :  { %vm57_vm0 = vcmp.gt.s32.totalorder %v56_v22, 0  ;;  %vm160_vm1 = vcmp.gt.s32.totalorder %v159_v25, 0 }
  0x92   :  { %v58_v26 = vsel %vm57_vm0, %v56_v22, 0  ;;  %v161_v29 = vsel %vm160_vm1, %v159_v25, 0  ;;  %v197_v25 = vshll.u32 %v157_v31, 8  ;;  %vm151_vm0 = vcmp.lt.s32.totalorder %v572_v12, 0 }
  0x93   :  { %v59_v27 = vshrl.u32 %v58_v26, 5  ;;  %v60_v28 = vand.u32 31, %v58_v26  ;;  %v587_v35 = vshrl.u32 %v161_v29, 5  ;;  %v163_v36 = vand.u32 31, %v161_v29 }
  0x94   :  { %vm150_vm1 = vcmp.le.f32.partialorder %v149_v18, 0.7853982 }
  0x95   :  { %v61_v32 = vsub.s32 32, %v60_v28  ;;  %v63_v34 = vshll.u32 %v530_v33, %v60_v28  ;;  %v66_v38 = vshll.u32 %v531_v37, %v60_v28  ;;  %v69_v40 = vshll.u32 %v532_v39, %v60_v28 }
  0x96   :  { %v72_v42 = vshll.u32 %v533_v41, %v60_v28  ;;  %v75_v44 = vshll.u32 %v534_v43, %v60_v28  ;;  %vm78_vm2 = vcmp.lt.s32.totalorder %v59_v27, 1  ;;  %vm79_vm3 = vcmp.lt.s32.totalorder %v59_v27, 2 }
  0x97   :  { %v64_v45 = vshrl.u32 %v531_v37, %v61_v32  ;;  %v67_v46 = vshrl.u32 %v532_v39, %v61_v32  ;;  %v70_v47 = vshrl.u32 %v533_v41, %v61_v32  ;;  %v62_v48 = vshrl.u32 %v530_v33, %v61_v32 }
  0x98   :  { %v73_v49 = vshrl.u32 %v534_v43, %v61_v32  ;;  %v76_v51 = vshrl.u32 %v535_v50, %v61_v32  ;;  %v164_v55 = vsub.s32 32, %v163_v36  ;;  %vm80_vm4 = vcmp.lt.s32.totalorder %v59_v27, 3 }
  0x99   :  { %v65_v52 = vor.u32 %v64_v45, %v63_v34  ;;  %v68_v53 = vor.u32 %v67_v46, %v66_v38  ;;  %v71_v54 = vor.u32 %v70_v47, %v69_v40  ;;  %vm81_vm5 = vcmp.lt.s32.totalorder %v59_v27, 4 }
  0x9a   :  { %v74_v56 = vor.u32 %v73_v49, %v72_v42  ;;  %v77_v57 = vor.u32 %v76_v51, %v75_v44  ;;  %v166_v1 = vshll.u32 %v530_v33, %v163_v36  ;;  %v167_v4 = vshrl.u32 %v531_v37, %v164_v55 }
  0x9b   :  { %v82_v58 = vsel %vm78_vm2, %v62_v48, %v65_v52  ;;  %v83_v59 = vsel %vm81_vm5, %v71_v54, 2102212464  ;;  %v86_v60 = vsel %vm78_vm2, %v65_v52, %v68_v53  ;;  %v90_v61 = vsel %vm78_vm2, %v68_v53, %v71_v54 }
  0x9c   :  { %v84_v62 = vsel %vm80_vm4, %v68_v53, %v83_v59  ;;  %v87_v63 = vsel %vm81_vm5, %v74_v56, 920167782  ;;  %v91_v0 = vsel %vm81_vm5, %v77_v57, 1326507024  ;;  %v169_v5 = vshll.u32 %v531_v37, %v163_v36 }
  0x9d   :  { %v88_v2 = vsel %vm80_vm4, %v71_v54, %v87_v63  ;;  %v92_v3 = vsel %vm80_vm4, %v74_v56, %v91_v0  ;;  %v85_v6 = vsel %vm79_vm3, %v82_v58, %v84_v62  ;;  %v170_v9 = vshrl.u32 %v532_v39, %v164_v55 }
  0x9e   :  { %v89_v7 = vsel %vm79_vm3, %v86_v60, %v88_v2  ;;  %v93_v8 = vsel %vm79_vm3, %v90_v61, %v92_v3  ;;  %v168_v17 = vor.u32 %v167_v4, %v166_v1  ;;  %v172_v20 = vshll.u32 %v532_v39, %v163_v36 }
  0x9f   :  { %v596_v10 = vmul.u32.u64.low %v584_v30, %v93_v8  ;;  %v597_v14 = vmul.u32.u64.high %v584_v30, %v93_v8, %v596_v10  ;;  %v600_v15 = vmul.u32.u64.low %v584_v30, %v89_v7  ;;  %v601_v16 = vmul.u32.u64.high %v584_v30, %v89_v7, %v600_v15 }
  0xa0   :  { %v171_v19 = vor.u32 %v170_v9, %v169_v5  ;;  %v173_v21 = vshrl.u32 %v533_v41, %v164_v55  ;;  %v175_v22 = vshll.u32 %v533_v41, %v163_v36  ;;  %v176_v23 = vshrl.u32 %v534_v43, %v164_v55 }
  0xa1   :  { %v179_v24 = vshrl.u32 %v535_v50, %v164_v55  ;;  %v101_v26 = vmul.u32 %v584_v30, %v85_v6  ;;  %v165_v27 = vshrl.u32 %v530_v33, %v164_v55  ;;  %v178_v29 = vshll.u32 %v534_v43, %v163_v36 }
  0xa2   :  { %v174_v28 = vor.u32 %v173_v21, %v172_v20  ;;  %vm103_vm6 = vc.u32 %v597_v14, %v600_v15  ;;  %v104_v32 = vadd.s32 1, %v601_v16  ;;  %v177_v34 = vor.u32 %v176_v23, %v175_v22 }
  0xa3   :  { %vm181_vm7 = vcmp.lt.s32.totalorder %v587_v35, 1  ;;  %v180_v37 = vor.u32 %v179_v24, %v178_v29  ;;  %vm183_vm8 = vcmp.lt.s32.totalorder %v587_v35, 3  ;;  %vm184_vm9 = vcmp.lt.s32.totalorder %v587_v35, 4 }
  0xa4   :  { %v189_v38 = vsel %vm181_vm7, %v168_v17, %v171_v19  ;;  %v105_v31 = vsel %vm103_vm6, %v104_v32, %v601_v16  ;;  %v186_v39 = vsel %vm184_vm9, %v174_v28, 2102212464  ;;  %v190_v30 = vsel %vm184_vm9, %v177_v34, 920167782 }
  0xa5   :  { %v193_v33 = vsel %vm181_vm7, %v171_v19, %v174_v28  ;;  %v106_v40 = vadd.s32 %v105_v31, %v101_v26  ;;  %vm182_vm10 = vcmp.lt.s32.totalorder %v587_v35, 2  ;;  %v191_v36 = vsel %vm183_vm8, %v174_v28, %v190_v30 }
  0xa6   :  { %v194_v41 = vsel %vm184_vm9, %v180_v37, 1326507024  ;;  %v185_v42 = vsel %vm181_vm7, %v165_v27, %v168_v17  ;;  %v187_v43 = vsel %vm183_vm8, %v171_v19, %v186_v39  ;;  %v192_v44 = vsel %vm182_vm10, %v189_v38, %v191_v36 }
  0xa7   :  { %v195_v45 = vsel %vm183_vm8, %v177_v34, %v194_v41  ;;  %v107_v46 = vadd.s32 536870912, %v106_v40  ;;  %v611_v48 = vmul.u32.u64.low %v197_v25, %v192_v44  ;;  %v612_v49 = vmul.u32.u64.high %v197_v25, %v192_v44, %v611_v48 }
  0xa8   :  { %v196_v47 = vsel %vm182_vm10, %v193_v33, %v195_v45  ;;  %v188_v53 = vsel %vm182_vm10, %v185_v42, %v187_v43  ;;  %v102_v5 = vadd.s32 %v600_v15, %v597_v14  ;;  %vm138_vm8 = vweird.f32 %v570_v11 }
  0xa9   :  { %v614_v50 = vmul.u32.u64.low %v197_v25, %v196_v47  ;;  %v615_v51 = vmul.u32.u64.high %v197_v25, %v196_v47, %v614_v50  ;;  %v108_v52 = vshrl.u32 %v107_v46, 30  ;;  %v207_v55 = vadd.s32 1, %v612_v49  ;;  %v24_v47 = vpop.permute.xlu1 %23 }
  0xaa   :  { %v204_v35 = vmul.u32 %v197_v25, %v188_v53  ;;  %v16_v50 = vld [vmem:[%s652_s0] sm:$0xff] }
  0xab   :  { %v109_v54 = vshll.u32 %v108_v52, 30  ;;  %vm206_vm11 = vc.u32 %v615_v51, %v611_v48  ;;  %v205_v26 = vadd.s32 %v611_v48, %v615_v51  ;;  %v132_v15 = vsub.s32 4, %v108_v52 }
  0xac   :  { %v208_v57 = vsel %vm206_vm11, %v207_v55, %v612_v49 }
  0xad   :  { %v110_v56 = vsub.s32 %v106_v40, %v109_v54  ;;  %v209_v58 = vadd.s32 %v208_v57, %v204_v35  ;;  %v133_v30 = vsel %vm48_vm14, %v132_v15, %v108_v52  ;;  %v26_v35 = vmul.f32 %v24_v47, %v16_v50  ;;  %v30_v57 = vpop.permute.xlu1 %29 }
  0xae   :  { %v135_v42 = vsel %vm47_vm15, 0, %v133_v30 }
  0xaf   :  { %v112_v59 = vsub.s32 0, %v110_v56  ;;  %v210_v60 = vadd.s32 536870912, %v209_v58  ;;  %v351_v45 = vadd.s32 3, %v135_v42  ;;  %v139_v51 = vand.u32 3, %v135_v42 }
  0xb1   :  { %v481_v61 = vmin.u32 %v112_v59, %v110_v56  ;;  %v211_v62 = vshrl.u32 %v210_v60, 30  ;;  %v352_v52 = vand.u32 3, %v351_v45  ;;  %vm141_vm2 = vcmp.eq.s32.totalorder %v139_v51, 0 }
  0xb2   :  { %vm144_vm3 = vcmp.eq.s32.totalorder %v139_v51, 2  ;;  %vm140_vm6 = vcmp.lt.s32.totalorder %v139_v51, 2 }
  0xb3   :  { %v114_v63 = vclz %v481_v61  ;;  %v212_v0 = vshll.u32 %v211_v62, 30  ;;  %v235_v44 = vsub.s32 4, %v211_v62  ;;  %vm357_vm4 = vcmp.eq.s32.totalorder %v352_v52, 2 }
  0xb4   :  { %vm354_vm5 = vcmp.eq.s32.totalorder %v352_v52, 0  ;;  %vm353_vm7 = vcmp.lt.s32.totalorder %v352_v52, 2 }
  0xb5   :  { %v482_v1 = vadd.s32 4294967294, %v114_v63  ;;  %v213_v2 = vsub.s32 %v209_v58, %v212_v0  ;;  %v236_v48 = vsel %vm151_vm0, %v235_v44, %v211_v62  ;;  %v32_v63 = vadd.f32 %v30_v57, %v26_v35 }
  0xb6   :  { %v238_v54 = vsel %vm150_vm1, 0, %v236_v48 }
  0xb7   :  { %vm483_vm12 = vcmp.lt.s32.totalorder %v482_v1, 0  ;;  %v215_v4 = vsub.s32 0, %v213_v2  ;;  %v455_v60 = vadd.s32 3, %v238_v54 }
  0xb8   :  { %v117_v3 = vsel %vm483_vm12, 0, %v482_v1 }
  0xb9   :  { %v118_v6 = vsub.s32 32, %v117_v3  ;;  %v122_v7 = vsub.s32 4294967266, %v117_v3  ;;  %v485_v8 = vmin.u32 %v215_v4, %v213_v2  ;;  %v119_v9 = vshll.u32 %v110_v56, %v117_v3  ;;  %v17_v4 = vld [vmem:[%s652_s0 + $0x8] sm:$0xff] }
  0xbb   :  { %v120_v10 = vshrl.u32 %v102_v5, %v118_v6  ;;  %v123_v16 = vadd.s32 127, %v122_v7  ;;  %v217_v17 = vclz %v485_v8  ;;  %v242_v5 = vand.u32 3, %v238_v54 }
  0xbc   :  { %v456_v7 = vand.u32 3, %v455_v60 }
  0xbd   :  { %v121_v19 = vor.u32 %v120_v10, %v119_v9  ;;  %v124_v20 = vshll.u32 %v123_v16, 23  ;;  %v486_v21 = vadd.s32 4294967294, %v217_v17  ;;  %vm247_vm9 = vcmp.eq.s32.totalorder %v242_v5, 2 }
  0xbe   :  { %vm461_vm10 = vcmp.eq.s32.totalorder %v456_v7, 2  ;;  %vm244_vm11 = vcmp.eq.s32.totalorder %v242_v5, 0  ;;  %vm458_vm12 = vcmp.eq.s32.totalorder %v456_v7, 0 }
  0xbf   :  { %v125_v22 = vor.u32 4788187, %v124_v20  ;;  %vm487_vm13 = vcmp.lt.s32.totalorder %v486_v21, 0  ;;  %v128_v24 = vcvt.s32.f32 %v121_v19  ;;  %v27_v19 = vmul.f32 %v24_v47, %v17_v4 }
  0xc0   :  { %v220_v25 = vsel %vm487_vm13, 0, %v486_v21  ;;  %vm243_vm13 = vcmp.lt.s32.totalorder %v242_v5, 2 }
  0xc1   :  { %v126_v23 = vand.u32 2147483647, %v125_v22  ;;  %v221_v27 = vsub.s32 32, %v220_v25  ;;  %v225_v28 = vsub.s32 4294967266, %v220_v25  ;;  %v222_v29 = vshll.u32 %v213_v2, %v220_v25 }
  0xc2   :  { %v33_v25 = vadd.f32 %v30_v57, %v27_v19 }
  0xc3   :  { %v129_v14 = vmul.f32 %v128_v24, %v126_v23  ;;  %v223_v32 = vshrl.u32 %v205_v26, %v221_v27  ;;  %v226_v34 = vadd.s32 127, %v225_v28 }
  0xc5   :  { %v130_v37 = vxor.u32 2147483648, %v129_v14  ;;  %v224_v38 = vor.u32 %v223_v32, %v222_v29  ;;  %v227_v31 = vshll.u32 %v226_v34, 23 }
  0xc7   :  { %v131_v39 = vsel %vm48_vm14, %v130_v37, %v129_v14  ;;  %v228_v40 = vor.u32 4788187, %v227_v31  ;;  %v231_v41 = vcvt.s32.f32 %v224_v38  ;;  %vm457_vm14 = vcmp.lt.s32.totalorder %v456_v7, 2 }
  0xc8   :  { %v134_v33 = vsel %vm47_vm15, %v570_v11, %v131_v39  ;;  %vm241_vm15 = vweird.f32 %v572_v12 }
  0xc9   :  { %518 = vcosq.f32 %v134_v33  ;;  %v229_v36 = vand.u32 2147483647, %v228_v40 }
  0xca   :  { %520 = vsinq.f32 %v134_v33 }
  0xcb   :  { %v232_v43 = vmul.f32 %v231_v41, %v229_v36 }
  0xcd   :  { %v233_v46 = vxor.u32 2147483648, %v232_v43 }
  0xcf   :  { %v234_v13 = vsel %vm151_vm0, %v233_v46, %v232_v43 }
  0xd0   :  { %v237_v49 = vsel %vm150_vm1, %v572_v12, %v234_v13 }
  0xd1   :  { %522 = vcosq.f32 %v237_v49 }
  0xd2   :  { %524 = vsinq.f32 %v237_v49 }
  0xd3   :  { %v519_v53 = vpop.eup %518 }
  0xd4   :  { %v521_v55 = vpop.eup %520  ;;  %v145_v56 = vxor.u32 2147483648, %v519_v53 }
  0xd5   :  { %v142_v18 = vxor.u32 2147483648, %v521_v55 }
  0xd6   :  { %v146_v58 = vsel %vm144_vm3, %v145_v56, %v521_v55  ;;  %v359_v59 = vsel %vm357_vm4, %v145_v56, %v521_v55 }
  0xd7   :  { %v143_v61 = vsel %vm141_vm2, %v519_v53, %v142_v18  ;;  %v356_v62 = vsel %vm354_vm5, %v519_v53, %v142_v18 }
  0xd8   :  { %v147_v0 = vsel %vm140_vm6, %v143_v61, %v146_v58  ;;  %v360_v1 = vsel %vm353_vm7, %v356_v62, %v359_v59 }
  0xd9   :  { %v148_v2 = vsel %vm138_vm8, nan, %v147_v0  ;;  %v361_v3 = vsel %vm138_vm8, nan, %v360_v1 }
  0xda   :  { %v252_v6 = vmul.f32 %v148_v2, %v32_v63  ;;  %v466_v8 = vmul.f32 %v361_v3, %v32_v63 }
  0xdb   :  { %v523_v9 = vpop.eup %522 }
  0xdc   :  { %v254_v10 = vadd.f32 2e-08, %v252_v6  ;;  %v468_v16 = vadd.f32 1e-08, %v466_v8  ;;  %v525_v17 = vpop.eup %524  ;;  %v248_v20 = vxor.u32 2147483648, %v523_v9 }
  0xdd   :  { %v245_v21 = vxor.u32 2147483648, %v525_v17 }
  0xde   :  { %256 = vst [vmem:[%s653_s3] sm:$0xff] %v254_v10  ;;  %470 = vst [vmem:[%s654_s4] sm:$0xff] %v468_v16  ;;  %v249_v11 = vsel %vm247_vm9, %v248_v20, %v525_v17  ;;  %v463_v22 = vsel %vm461_vm10, %v248_v20, %v525_v17 }
  0xdf   :  { %v246_v23 = vsel %vm244_vm11, %v523_v9, %v245_v21  ;;  %v460_v24 = vsel %vm458_vm12, %v523_v9, %v245_v21 }
  0xe0   :  { %v250_v26 = vsel %vm243_vm13, %v246_v23, %v249_v11  ;;  %v464_v27 = vsel %vm457_vm14, %v460_v24, %v463_v22 }
  0xe1   :  { %v251_v28 = vsel %vm241_vm15, nan, %v250_v26  ;;  %v465_v14 = vsel %vm241_vm15, nan, %v464_v27 }
  0xe2   :  { %v253_v15 = vmul.f32 %v251_v28, %v33_v25  ;;  %v467_v29 = vmul.f32 %v465_v14, %v33_v25 }
  0xe4   :  { %v255_v32 = vadd.f32 2e-08, %v253_v15  ;;  %v469_v34 = vadd.f32 1e-08, %v467_v29 }
  0xe6   :  { %257 = vst [vmem:[%s653_s3 + $0x8] sm:$0xff] %v255_v32  ;;  %471 = vst [vmem:[%s654_s4 + $0x8] sm:$0xff] %v469_v34 }

// kernel: reverse.0
= control target key start
LH: loop header
LB: loop body
LE: loop exit
PB: predicated region body
PF: predicated region fallthrough
CT: control target
= control target key end

     0   :  { %v71_v3 = vlaneseq  ;;  %v64_v9 = vld [vmem:[#allocation0 + $0x7] ss:$-1 sm:$0xff]  ;;  %v78_v12 = vld [vmem:[#allocation0 + $0x17] ss:$-1 sm:$0xff]  ;;  %s329_s0 = inlined_call_operand.vmem [shape: f32[2,4,16,7], index: 0, kind: input, shape index: {}]   ;;  %s330_s1 = inlined_call_operand.vmem [shape: f32[2,4,16,7], index: 1, kind: output, shape index: {}]  }
   0x1   :  { %v44_v0 = vld [vmem:[%s329_s0] sm:$0xff]  ;;  %v46_v1 = vld [vmem:[%s329_s0 + $0x8] sm:$0xff]  ;;  %v48_v2 = vld [vmem:[%s329_s0 + $0x10] sm:$0xff]  ;;  %v65_v10 = vrot.slane %v64_v9, 1  ;;  %v79_v14 = vrot.slane %v78_v12, 1 }
   0x2   :  { %45 = vst [vmem:[#allocation0 + $0x8] sm:$0xff] %v44_v0  ;;  %47 = vst [vmem:[#allocation0 + $0x18] sm:$0xff] %v46_v1  ;;  %v50_v4 = vld [vmem:[%s329_s0 + $0x18] sm:$0xff]  ;;  %v52_v5 = vld [vmem:[%s329_s0 + $0x20] sm:$0xff]  ;;  %v72_v11 = vshrl.u32 %v71_v3, 7 }
   0x3   :  { %49 = vst [vmem:[#allocation0 + $0x28] sm:$0xff] %v48_v2  ;;  %v54_v6 = vld [vmem:[%s329_s0 + $0x28] sm:$0xff]  ;;  %51 = vst [vmem:[#allocation0 + $0x38] sm:$0xff] %v50_v4  ;;  %v56_v7 = vld [vmem:[%s329_s0 + $0x30] sm:$0xff] }
   0x4   :  { %53 = vst [vmem:[#allocation0 + $0x48] sm:$0xff] %v52_v5  ;;  %55 = vst [vmem:[#allocation0 + $0x58] sm:$0xff] %v54_v6  ;;  %v58_v8 = vld [vmem:[%s329_s0 + $0x38] sm:$0xff]  ;;  %v92_v13 = vld [vmem:[#allocation0 + $0x27] ss:$-1 sm:$0xff]  ;;  %vm73_vm0 = vcmp.lt.s32.totalorder %v72_v11, 7 }
   0x5   :  { %57 = vst [vmem:[#allocation0 + $0x68] sm:$0xff] %v56_v7  ;;  %59 = vst [vmem:[#allocation0 + $0x78] sm:$0xff] %v58_v8  ;;  %v93_v15 = vrot.slane %v92_v13, 1  ;;  %v106_v16 = vld [vmem:[#allocation0 + $0x37] ss:$-1 sm:$0xff] }
   0x6   :  { %66 = vst [vmem:[#allocation1] sm:$0xff] %v65_v10  ;;  %v107_v17 = vrot.slane %v106_v16, 1  ;;  %v120_v18 = vld [vmem:[#allocation0 + $0x47] ss:$-1 sm:$0xff]  ;;  %v134_v19 = vld [vmem:[#allocation0 + $0x57] ss:$-1 sm:$0xff] }
   0x7   :  { %80 = vst [vmem:[#allocation1 + $0x8] sm:$0xff] %v79_v14  ;;  %94 = vst [vmem:[#allocation1 + $0x10] sm:$0xff] %v93_v15  ;;  %v121_v20 = vrot.slane %v120_v18, 1  ;;  %v135_v21 = vrot.slane %v134_v19, 1  ;;  %v148_v22 = vld [vmem:[#allocation0 + $0x67] ss:$-1 sm:$0xff] }
   0x8   :  { %v162_v23 = vld [vmem:[#allocation0 + $0x77] ss:$-1 sm:$0xff]  ;;  %108 = vst [vmem:[#allocation1 + $0x18] sm:$0xff] %v107_v17  ;;  %v149_v24 = vrot.slane %v148_v22, 1 }
   0x9   :  { %v163_v25 = vrot.slane %v162_v23, 1  ;;  %v69_v26 = vld [vmem:[#allocation0 + $0xf] ss:$-1 sm:$0xff]  ;;  %v83_v27 = vld [vmem:[#allocation0 + $0x1f] ss:$-1 sm:$0xff]  ;;  %122 = vst [vmem:[#allocation1 + $0x20] sm:$0xff] %v121_v20 }
   0xa   :  { %v97_v28 = vld [vmem:[#allocation0 + $0x2f] ss:$-1 sm:$0xff]  ;;  %136 = vst [vmem:[#allocation1 + $0x28] sm:$0xff] %v135_v21  ;;  %v70_v29 = vrot.slane %v69_v26, 1  ;;  %v84_v30 = vrot.slane %v83_v27, 1  ;;  %150 = vst [vmem:[#allocation1 + $0x30] sm:$0xff] %v149_v24 }
   0xb   :  { %v98_v31 = vrot.slane %v97_v28, 1  ;;  %v111_v32 = vld [vmem:[#allocation0 + $0x3f] ss:$-1 sm:$0xff]  ;;  %164 = vst [vmem:[#allocation1 + $0x38] sm:$0xff] %v163_v25  ;;  %v125_v34 = vld [vmem:[#allocation0 + $0x4f] ss:$-1 sm:$0xff] }
   0xc   :  { %v112_v33 = vrot.slane %v111_v32, 1  ;;  %v139_v35 = vld [vmem:[#allocation0 + $0x5f] ss:$-1 sm:$0xff]  ;;  %74 = vst.msk [vmem:[#allocation1] sm:$0xff] %vm73_vm0, %v70_v29  ;;  %88 = vst.msk [vmem:[#allocation1 + $0x8] sm:$0xff] %vm73_vm0, %v84_v30  ;;  %v126_v36 = vrot.slane %v125_v34, 1 }
   0xd   :  { %102 = vst.msk [vmem:[#allocation1 + $0x10] sm:$0xff] %vm73_vm0, %v98_v31  ;;  %v140_v37 = vrot.slane %v139_v35, 1  ;;  %v153_v38 = vld [vmem:[#allocation0 + $0x6f] ss:$-1 sm:$0xff]  ;;  %v167_v39 = vld [vmem:[#allocation0 + $0x7f] ss:$-1 sm:$0xff] }
   0xe   :  { %116 = vst.msk [vmem:[#allocation1 + $0x18] sm:$0xff] %vm73_vm0, %v112_v33  ;;  %v154_v40 = vrot.slane %v153_v38, 1  ;;  %v168_v41 = vrot.slane %v167_v39, 1  ;;  %130 = vst.msk [vmem:[#allocation1 + $0x20] sm:$0xff] %vm73_vm0, %v126_v36 }
   0xf   :  { %144 = vst.msk [vmem:[#allocation1 + $0x28] sm:$0xff] %vm73_vm0, %v140_v37 }
  0x10   :  { %158 = vst.msk [vmem:[#allocation1 + $0x30] sm:$0xff] %vm73_vm0, %v154_v40  ;;  %172 = vst.msk [vmem:[#allocation1 + $0x38] sm:$0xff] %vm73_vm0, %v168_v41 }
  0x13   :  { %v214_v42 = vld [vmem:[#allocation1] sm:$0xff]  ;;  %v216_v43 = vld [vmem:[#allocation1 + $0x8] sm:$0xff] }
  0x14   :  { %v218_v44 = vld [vmem:[#allocation1 + $0x10] sm:$0xff]  ;;  %215 = vst [vmem:[%s330_s1] sm:$0xff] %v214_v42  ;;  %217 = vst [vmem:[%s330_s1 + $0x8] sm:$0xff] %v216_v43 }
  0x15   :  { %219 = vst [vmem:[%s330_s1 + $0x10] sm:$0xff] %v218_v44  ;;  %v220_v45 = vld [vmem:[#allocation1 + $0x18] sm:$0xff]  ;;  %v222_v46 = vld [vmem:[#allocation1 + $0x20] sm:$0xff] }
  0x16   :  { %221 = vst [vmem:[%s330_s1 + $0x18] sm:$0xff] %v220_v45  ;;  %v224_v47 = vld [vmem:[#allocation1 + $0x28] sm:$0xff]  ;;  %223 = vst [vmem:[%s330_s1 + $0x20] sm:$0xff] %v222_v46 }
  0x17   :  { %225 = vst [vmem:[%s330_s1 + $0x28] sm:$0xff] %v224_v47  ;;  %v226_v48 = vld [vmem:[#allocation1 + $0x30] sm:$0xff]  ;;  %v228_v49 = vld [vmem:[#allocation1 + $0x38] sm:$0xff] }
  0x18   :  { %227 = vst [vmem:[%s330_s1 + $0x30] sm:$0xff] %v226_v48  ;;  %229 = vst [vmem:[%s330_s1 + $0x38] sm:$0xff] %v228_v49 }

</bundles_post_ra>
